<compile_context>
chip_gen: v7x
topology: tpu7x:2x2x1
jax: 0.10.0
libtpu: 0.0.40
codegen_flags: <defaults>
</compile_context>

<pallas_src>
import jax
import jax.numpy as jnp
from jax.experimental import pallas as pl
from jax.experimental.pallas import tpu as pltpu


def _round_up(x, m):
    return (x + m - 1) // m * m


def _conv_stats_kernel(pt_ref, wt_ref, y_ref, sum_ref, ssq_ref):
    """One M-tile of the K-folded conv + per-tile BN partial statistics.

    pt_ref  : (Kp, TM)     bf16  im2col^T tile (K = 27*Cin, zero-padded to Kp)
    wt_ref  : (Cout, Kp)   bf16  folded conv weights (transposed)
    y_ref   : (Cout, TM)   f32   conv output tile (lane-dense)
    sum_ref : (1, Cout, 1) f32   per-tile per-channel sum
    ssq_ref : (1, Cout, 1) f32   per-tile per-channel sum of squares
    """
    y = jnp.dot(wt_ref[...], pt_ref[...], preferred_element_type=jnp.float32)
    y_ref[...] = y
    sum_ref[0] = jnp.sum(y, axis=1, keepdims=True)
    ssq_ref[0] = jnp.sum(y * y, axis=1, keepdims=True)


def _bn_relu_kernel(y_ref, scale_ref, shift_ref, o_ref):
    """Normalize + affine + ReLU on a lane-dense (Cout, TM) tile (all f32)."""
    o_ref[...] = jnp.maximum(y_ref[...] * scale_ref[...] + shift_ref[...], 0.0)


def cna_forward(x_ncdhw, weight_oidhw, bias, gamma, beta, *, eps=1e-5, tm=512):
    """Forward of CNA: Conv3d(3,1,1) -> BatchNorm3d (training stats) -> ReLU.

    x_ncdhw      : (N, Cin, D, H, W) f32 (PyTorch layout)
    weight_oidhw : (Cout, Cin, 3, 3, 3) f32
    bias         : (Cout,) f32  -- mathematically cancelled by train-mode BN
    gamma, beta  : (Cout,) f32  BatchNorm affine parameters
    returns      : (N, Cout, D, H, W) f32
    """
    N, Cin, D, H, W = x_ncdhw.shape
    Cout = weight_oidhw.shape[0]
    M = N * D * H * W
    K = 27 * Cin

    TM = min(tm, _round_up(M, 128))          # lane-dense M tile
    Mp = _round_up(M, TM)
    Kp = _round_up(K, 8)                     # sublane-aligned contraction dim
    num_tiles = Mp // TM

    # ---- wrapper prep: layout, padding, im2col^T, folded weights -----------
    # NCDHW -> NDHWC, zero-pad spatial dims by 1, bf16 for the MXU.
    x_ndhwc = jnp.transpose(x_ncdhw, (0, 2, 3, 4, 1)).astype(jnp.bfloat16)
    x_pad = jnp.pad(x_ndhwc, ((0, 0), (1, 1), (1, 1), (1, 1), (0, 0)))

    # im2col^T slab: (27*Cin, M); row index = tap*Cin + cin, col = (n,d,h,w).
    taps = []
    for kd in range(3):
        for kh in range(3):
            for kw in range(3):
                taps.append(x_pad[:, kd:kd + D, kh:kh + H, kw:kw + W, :])
    pt = jnp.stack(taps, axis=0)             # (27, N, D, H, W, Cin)
    pt = jnp.moveaxis(pt, -1, 1)             # (27, Cin, N, D, H, W)
    ptT = pt.reshape(K, M)
    ptT = jnp.pad(ptT, ((0, Kp - K), (0, Mp - M)))          # zero pad K and M

    # (Cout, Cin, 3, 3, 3) -> (Cout, 27*Cin) with the same (tap, cin) order.
    wT = jnp.transpose(weight_oidhw, (0, 2, 3, 4, 1)).reshape(Cout, K)
    wT = jnp.pad(wT, ((0, 0), (0, Kp - K))).astype(jnp.bfloat16)

    # Conv bias is a per-channel constant -> exactly removed by the batch-mean
    # subtraction of train-mode BatchNorm3d. Skip the add and the extra input.
    del bias

    cparams = pltpu.CompilerParams(
        dimension_semantics=("parallel",),          # both TCs on v7x
        vmem_limit_bytes=32 * 1024 * 1024,          # safe for v7x's 64 MiB VMEM
    )

    # ---- pass 1: K-folded conv matmul + per-tile BN partial sums -----------
    y_cm, sums, ssqs = pl.pallas_call(
        _conv_stats_kernel,
        grid=(num_tiles,),
        in_specs=[
            pl.BlockSpec((Kp, TM), lambda i: (0, i)),        # im2col^T tile
            pl.BlockSpec((Cout, Kp), lambda i: (0, 0)),      # folded weights
        ],
        out_specs=[
            pl.BlockSpec((Cout, TM), lambda i: (0, i)),      # conv out (lane-dense)
            pl.BlockSpec((1, Cout, 1), lambda i: (i, 0, 0)),  # per-tile sums
            pl.BlockSpec((1, Cout, 1), lambda i: (i, 0, 0)),  # per-tile sumsq
        ],
        out_shape=[
            jax.ShapeDtypeStruct((Cout, Mp), jnp.float32),
            jax.ShapeDtypeStruct((num_tiles, Cout, 1), jnp.float32),
            jax.ShapeDtypeStruct((num_tiles, Cout, 1), jnp.float32),
        ],
        compiler_params=cparams,
    )(ptT, wT)

    # ---- tiny global reduction + BN fold (XLA, f32) -------------------------
    # Zero-padded M columns contribute exactly 0 to sum/sumsq (no bias), so
    # dividing by the *real* M gives exact training-mode (biased) statistics.
    g = gamma.astype(jnp.float32)
    b = beta.astype(jnp.float32)
    s = jnp.sum(sums, axis=(0, 2))                  # (Cout,)
    ss = jnp.sum(ssqs, axis=(0, 2))                 # (Cout,)
    mean = s / M
    var = ss / M - mean * mean                      # biased variance
    inv_std = jax.lax.rsqrt(var + eps)
    scale = (g * inv_std).reshape(Cout, 1)
    shift = (b - mean * g * inv_std).reshape(Cout, 1)

    # ---- pass 2: normalize + affine + ReLU (lane-dense, f32 epilogue) -------
    out_cm = pl.pallas_call(
        _bn_relu_kernel,
        grid=(num_tiles,),
        in_specs=[
            pl.BlockSpec((Cout, TM), lambda i: (0, i)),
            pl.BlockSpec((Cout, 1), lambda i: (0, 0)),
            pl.BlockSpec((Cout, 1), lambda i: (0, 0)),
        ],
        out_specs=pl.BlockSpec((Cout, TM), lambda i: (0, i)),
        out_shape=jax.ShapeDtypeStruct((Cout, Mp), jnp.float32),
        compiler_params=cparams,
    )(y_cm, scale, shift)

    # (Cout, M) -> (N, Cout, D, H, W) to match the PyTorch output layout.
    out = out_cm[:, :M].reshape(Cout, N, D, H, W)
    return jnp.transpose(out, (1, 0, 2, 3, 4))


def _reference(x_ncdhw, weight_oidhw, bias, gamma, beta, eps=1e-5):
    """Plain-JAX reference (conv3d + train-mode BN + ReLU) for validation.

    Inputs are rounded through bf16 so the comparison matches the kernel's
    bf16-input / f32-accumulate MXU path (bf16 products are exact in f32).
    The conv bias is included to demonstrate it is cancelled by BN.
    """
    x_ndhwc = jnp.transpose(x_ncdhw, (0, 2, 3, 4, 1))
    x_ndhwc = x_ndhwc.astype(jnp.bfloat16).astype(jnp.float32)
    w_dhwio = jnp.transpose(weight_oidhw, (2, 3, 4, 1, 0))
    w_dhwio = w_dhwio.astype(jnp.bfloat16).astype(jnp.float32)
    y = jax.lax.conv_general_dilated(
        x_ndhwc, w_dhwio, window_strides=(1, 1, 1),
        padding=((1, 1), (1, 1), (1, 1)),
        dimension_numbers=("NDHWC", "DHWIO", "NDHWC"),
        precision=jax.lax.Precision.HIGHEST)
    y = y + bias.reshape(1, 1, 1, 1, -1)
    mean = y.mean(axis=(0, 1, 2, 3), keepdims=True)
    var = ((y - mean) ** 2).mean(axis=(0, 1, 2, 3), keepdims=True)
    y = (y - mean) * jax.lax.rsqrt(var + eps)
    y = y * gamma.reshape(1, 1, 1, 1, -1) + beta.reshape(1, 1, 1, 1, -1)
    y = jnp.maximum(y, 0.0)
    return jnp.transpose(y, (0, 4, 1, 2, 3))


if __name__ == "__main__":
    # Small shapes consistent with Conv3d / BatchNorm3d: NCDHW input.
    N, Cin, Cout, D, H, W = 2, 4, 8, 8, 8, 8

    key = jax.random.PRNGKey(0)
    kx, kw, kb, kg, kbe = jax.random.split(key, 5)

    x = jax.random.normal(kx, (N, Cin, D, H, W), dtype=jnp.float32)
    weight = jax.random.normal(kw, (Cout, Cin, 3, 3, 3), dtype=jnp.float32) * 0.1
    bias = jax.random.normal(kb, (Cout,), dtype=jnp.float32) * 0.1
    gamma = 1.0 + 0.1 * jax.random.normal(kg, (Cout,), dtype=jnp.float32)
    beta = 0.1 * jax.random.normal(kbe, (Cout,), dtype=jnp.float32)

    out = jax.block_until_ready(cna_forward(x, weight, bias, gamma, beta))
    ref = jax.block_until_ready(_reference(x, weight, bias, gamma, beta))

    assert out.shape == (N, Cout, D, H, W), out.shape
    max_err = float(jnp.max(jnp.abs(out - ref)))
    assert max_err < 2e-3, max_err

    print("KERNEL_OK")
</pallas_src>

<mosaic_0001>
module attributes {stable_mosaic.version = 11 : i64} {
  func.func @_conv_stats_kernel(%arg0: i32, %arg1: memref<112x512xbf16, #tpu.memory_space<vmem>>, %arg2: memref<8x112xbf16, #tpu.memory_space<vmem>>, %arg3: memref<8x512xf32, #tpu.memory_space<vmem>>, %arg4: memref<1x8x1xf32, #tpu.memory_space<vmem>>, %arg5: memref<1x8x1xf32, #tpu.memory_space<vmem>>) attributes {dimension_semantics = [#tpu.dimension_semantics<parallel>], iteration_bounds = array<i64: 2>, scalar_prefetch = 0 : i64, scratch_operands = 0 : i64, tpu.core_type = #tpu.core_type<tc>, window_params = [{transform_indices = @transform_0, window_bounds = array<i64: 112, 512>}, {pipeline_mode = #tpu.pipeline_mode<synchronous>, transform_indices = @transform_1, window_bounds = array<i64: 8, 112>}, {transform_indices = @transform_2, window_bounds = array<i64: 8, 512>}, {transform_indices = @transform_3, window_bounds = array<i64: 1, 8, 1>}, {transform_indices = @transform_4, window_bounds = array<i64: 1, 8, 1>}]} {
    %c0 = arith.constant 0 : index
    %c0_0 = arith.constant 0 : index
    %0 = vector.load %arg2[%c0, %c0_0] : memref<8x112xbf16, #tpu.memory_space<vmem>>, vector<8x112xbf16>
    %c0_1 = arith.constant 0 : index
    %c0_2 = arith.constant 0 : index
    %1 = vector.load %arg1[%c0_1, %c0_2] : memref<112x512xbf16, #tpu.memory_space<vmem>>, vector<112x512xbf16>
    %cst = arith.constant dense<0.000000e+00> : vector<8x512xf32>
    %2 = tpu.matmul %0, %1, %cst {dimension_numbers = #tpu.dot_dimension_numbers<[1], [0], [0], [1], [0, 0, 1, 1], [], []>} : vector<8x112xbf16>, vector<112x512xbf16>, vector<8x512xf32> -> vector<8x512xf32>
    %c0_3 = arith.constant 0 : index
    %c0_4 = arith.constant 0 : index
    %3 = vector.load %arg3[%c0_3, %c0_4] : memref<8x512xf32, #tpu.memory_space<vmem>>, vector<8x512xf32>
    tpu.vector_store %arg3[%c0_3, %c0_4], %2 {strides = array<i32>} : memref<8x512xf32, #tpu.memory_space<vmem>>, vector<8x512xf32>,
    %cst_5 = arith.constant dense<0.000000e+00> : vector<8xf32>
    %4 = vector.multi_reduction <add>, %2, %cst_5 [1] : vector<8x512xf32> to vector<8xf32>
    %5 = vector.shape_cast %4 : vector<8xf32> to vector<8x1xf32>
    %c0_6 = arith.constant 0 : index
    %c0_7 = arith.constant 0 : index
    %c0_8 = arith.constant 0 : index
    %6 = vector.load %arg4[%c0_6, %c0_7, %c0_8] : memref<1x8x1xf32, #tpu.memory_space<vmem>>, vector<1x8x1xf32>
    %7 = vector.shape_cast %6 : vector<1x8x1xf32> to vector<8x1xf32>
    %8 = vector.shape_cast %5 : vector<8x1xf32> to vector<1x8x1xf32>
    tpu.vector_store %arg4[%c0_6, %c0_7, %c0_8], %8 {strides = array<i32>} : memref<1x8x1xf32, #tpu.memory_space<vmem>>, vector<1x8x1xf32>,
    %9 = arith.mulf %2, %2 : vector<8x512xf32>
    %cst_9 = arith.constant dense<0.000000e+00> : vector<8xf32>
    %10 = vector.multi_reduction <add>, %9, %cst_9 [1] : vector<8x512xf32> to vector<8xf32>
    %11 = vector.shape_cast %10 : vector<8xf32> to vector<8x1xf32>
    %c0_10 = arith.constant 0 : index
    %c0_11 = arith.constant 0 : index
    %c0_12 = arith.constant 0 : index
    %12 = vector.load %arg5[%c0_10, %c0_11, %c0_12] : memref<1x8x1xf32, #tpu.memory_space<vmem>>, vector<1x8x1xf32>
    %13 = vector.shape_cast %12 : vector<1x8x1xf32> to vector<8x1xf32>
    %14 = vector.shape_cast %11 : vector<8x1xf32> to vector<1x8x1xf32>
    tpu.vector_store %arg5[%c0_10, %c0_11, %c0_12], %14 {strides = array<i32>} : memref<1x8x1xf32, #tpu.memory_space<vmem>>, vector<1x8x1xf32>,
    return
  }
  func.func @transform_0(%arg0: i32) -> (i32, i32) {
    %c0_i32 = arith.constant 0 : i32
    %c0_i32_0 = arith.constant 0 : i32
    return %c0_i32, %arg0 : i32, i32
  }
  func.func @transform_1(%arg0: i32) -> (i32, i32) {
    %c0_i32 = arith.constant 0 : i32
    %c0_i32_0 = arith.constant 0 : i32
    %c0_i32_1 = arith.constant 0 : i32
    return %c0_i32, %c0_i32_0 : i32, i32
  }
  func.func @transform_2(%arg0: i32) -> (i32, i32) {
    %c0_i32 = arith.constant 0 : i32
    %c0_i32_0 = arith.constant 0 : i32
    return %c0_i32, %arg0 : i32, i32
  }
  func.func @transform_3(%arg0: i32) -> (i32, i32, i32) {
    %c0_i32 = arith.constant 0 : i32
    %c0_i32_0 = arith.constant 0 : i32
    %c0_i32_1 = arith.constant 0 : i32
    return %arg0, %c0_i32, %c0_i32_0 : i32, i32, i32
  }
  func.func @transform_4(%arg0: i32) -> (i32, i32, i32) {
    %c0_i32 = arith.constant 0 : i32
    %c0_i32_0 = arith.constant 0 : i32
    %c0_i32_1 = arith.constant 0 : i32
    return %arg0, %c0_i32, %c0_i32_0 : i32, i32, i32
  }
}

</mosaic_0001>

<bundles_post_ra>
// kernel: tpu_custom_call.1
= control target key start
LH: loop header
LB: loop body
LE: loop exit
PB: predicated region body
PF: predicated region fallthrough
CT: control target
= control target key end

     0   :  { %10 = vsyncpa [#allocation3], 0  ;;  %s1230_s0 = inlined_call_operand.hbm [shape: bf16[112,1024], index: 0, kind: input, shape index: {}]   ;;  %s1231_s1 = inlined_call_operand.hbm [shape: bf16[8,112], index: 1, kind: input, shape index: {}]   ;;  %s1232_s2 = inlined_call_operand.hbm [shape: f32[8,1024], index: 2, kind: output, shape index: {0}]   ;;  %s1233_s3 = inlined_call_operand.vmem [shape: f32[2,8,1], index: 3, kind: output, shape index: {1}]   ;;  %s1234_s4 = inlined_call_operand.vmem [shape: f32[2,8,1], index: 4, kind: output, shape index: {2}]  }
   0x1   :  { %12 = vsyncpa [#allocation3 + $0x1], 0 }
   0x2   :  { %13 = vsyncpa [#allocation6], 0 }
   0x3   :  { %14 = vsyncpa [#allocation4], 0 }
   0x4   :  { %16 = vsyncpa [#allocation4 + $0x1], 0  ;;  %s1001_s15 = smov 0   ;;  %s1003_s16 = smov 0  }
   0x5   :  { %s1005_s17 = smov 0   ;;  %s1007_s18 = smov 0  }
   0x6 LB: > { %s1022_s19 = sadd.s32 4294967295, %s967_s18   ;;  %s686_s20 = sadd.s32 4294967294, %s967_s18   ;;  %s967_s18 = sphi %s1007_s18, %s1259_s18   ;;  %s963_s17 = sphi %s1005_s17, %s1258_s17   ;;  %s959_s16 = sphi %s1003_s16, %s1257_s16   ;;  %s955_s15 = sphi %s1001_s15, %s1256_s15  }
   0x7   : > { %s1026_s21 = sadd.s32 1, %s967_s18   ;;  %s29_s22 = sadd.s32 1, %s963_s17 }
   0x8   : > { %s26_s23 = ssub.s32 %s967_s18, %s1026_s21  ;;  %p36_p0 = scmp.ne.s32.totalorder %s963_s17, %s959_s16 }
   0x9   : > { %p27_p1 = scmp.eq.s32.totalorder %s26_s23, 0  ;;  %p37_p2 = scmp.eq.s32.totalorder %s967_s18, 0 }
   0xa   : > { %p42_p3 = scmp.ne.s32.totalorder %s959_s16, %s955_s15  ;;  %p1235_p4 = scmp.eq.s32.totalorder %s1022_s19, 0 }
   0xb   : > { %s1038_s24 = scalar_select %p27_p1, %s963_s17, %s29_s22  }
   0xc   : > { %p1040_p5 = por %p37_p2, %p36_p0  ;;  %p1046_p6 = por %p1235_p4, %p42_p3 }
   0xd   : > { %p87_p7 = scmp.eq.s32.totalorder %s1022_s19, 1  ;;  %p93_p8 = scmp.eq.s32.totalorder %s686_s20, 1 }
   0xe   : > { %s1241_s26 = scalar_select %p1046_p6, 1, 0 }
   0xf   : > { %p687_p9 = scmp.ge.s32.totalorder %s967_s18, 1  ;;  %p152_p10 = scmp.lt.s32.totalorder %s967_s18, 3 }
  0x10   : > { %p1053_p11 = por %p87_p7, %p36_p0  ;;  %p1057_p12 = por %p93_p8, %p42_p3 }
  0x11   : > { %p1061_p13 = pnand %p687_p9, %p152_p10  ;;  %s969_s30 = smov [#allocation5]  }
  0x12   : > { %s1242_s27 = scalar_select %p1053_p11, 1, 0 }
  0x13   : > { %s1243_s28 = scalar_select %p1057_p12, 1, 0 }
  0x14   : > { %s1244_s29 = scalar_select %p1061_p13, 1, 0 }
  0x15   : > { %p744_p2 = pneg %p1061_p13  ;;  %s165_s5 = sshll.u32 %s969_s30, 4  ;;  %s166_s5 = int_to_ptr.vmem [resolvable:$true] %s165_s5 }
  0x16   : > { %p757_p4 = scmp.lt.s32.totalorder %s967_s18, 2  ;;  %p1245_p0 = scmp.eq.s32.totalorder %s1022_s19, 0 }
  0x17   : > { %s176_s7 = sand.u32 1, %s963_s17   ;;  %s839_s12 = scalar_lea.hbm %s1231_s1, 64 }
  0x18   : > { %p1071_p7 = pnand %p744_p2, %p1245_p0  ;;  %p1078_p3 = pnand %p757_p4, %p1040_p5 }
  0x19   : > { %s734_s9 = smul.u32 224, %s176_s7  ;;  %p840_p8 = scmp.ne.s32.totalorder %s1231_s1, %s839_s12 }
  0x1a   : > { %s1247_s8 = scalar_select %p1078_p3, 1, 0 }
  0x1b   : > { %p841_p9 = pneg %p1071_p7  ;;  %p846_p4 = scmp.lt.u32.totalorder %s839_s12, %s1231_s1 }
  0x1d   : > { %p842_p10 = pnand %p841_p9, %p840_p8 }
  0x1f   : > { %p843_p2 = pneg %p842_p10 }
  0x21   : > { %p848_p5 = pnand %p846_p4, %p843_p2 }
  0x23   : > { %851 = shalt.err (!%p848_p5)
}
  0x24   : > { %s852_s23 = scalar_lea.vmem %s166_s5, 64  ;;  %p860_p11 = scmp.lt.s32.totalorder %s166_s5, %s166_s5 }
  0x25   : > { %p853_p0 = scmp.ne.s32.totalorder %s166_s5, %s852_s23  ;;  %p861_p6 = scmp.lt.s32.totalorder %s852_s23, %s852_s23 }
  0x27   : > { %p855_p1 = pnand %p853_p0, %p841_p9  ;;  %p862_p13 = por %p861_p6, %p860_p11 }
  0x29   : > { %p856_p12 = pneg %p855_p1 }
  0x2b   : > { %p863_p3 = pnand %p862_p13, %p856_p12 }
  0x2d   : > { %866 = shalt.err (!%p863_p3)
}
  0x2e   : > { %747 = dma.hbm_to_vmem [thread:$0]  (!%p1071_p7), %s1231_s1, 64, %s166_s5, [#allocation6]  }
  0x2f   : > { %s732_s10 = sshll.u32 %s967_s18, 8  ;;  %s180_s11 = scalar_lea.vmem [#allocation2], %s734_s9 }
  0x30   : > { %s187_s12 = sshll.u32 %s180_s11, 4  ;;  %s1102_s20 = scalar_lea.hbm %s1230_s0, %s732_s10  ;;  %s1104_s12 = int_to_ptr.vmem [resolvable:$true] %s187_s12 }
  0x31   : > { %s1106_s6 = scalar_lea.sflag [#allocation3], %s176_s7  ;;  %s867_s22 = scalar_lea.hbm %s1102_s20, 3584 }
  0x32   : > { %p868_p6 = scmp.ne.s32.totalorder %s1102_s20, %s867_s22  ;;  %p1248_p11 = scmp.ne.s32.totalorder %s1247_s8, 0 }
  0x33   : > { %s872_s23 = scalar_lea.hbm %s1230_s0, 7168  ;;  %p873_p7 = scmp.lt.u32.totalorder %s1102_s20, %s1230_s0 }
  0x34   : > { %p869_p12 = pneg %p1248_p11  ;;  %p874_p3 = scmp.lt.u32.totalorder %s872_s23, %s867_s22 }
  0x35   : > { %p876_p9 = scmp.lt.u32.totalorder %s867_s22, %s1102_s20 }
  0x36   : > { %p870_p13 = pnand %p869_p12, %p868_p6  ;;  %p875_p8 = por %p874_p3, %p873_p7 }
  0x38   : > { %p871_p1 = pneg %p870_p13  ;;  %p877_p10 = por %p876_p9, %p875_p8 }
  0x3a   : > { %p878_p2 = pnand %p877_p10, %p871_p1 }
  0x3c   : > { %881 = shalt.err (!%p878_p2)
}
  0x3d   : > { %s882_s7 = scalar_lea.vmem %s1104_s12, 3584  ;;  %s970_s10 = smov [#allocation2]  }
  0x3e   : > { %p883_p4 = scmp.ne.s32.totalorder %s1104_s12, %s882_s7  ;;  %s887_s11 = sshll.u32 %s970_s10, 4  ;;  %s888_s11 = int_to_ptr.vmem [resolvable:$false] %s887_s11 }
  0x3f   : > { %s889_s13 = scalar_lea.vmem %s888_s11, 7168  ;;  %p890_p6 = scmp.lt.s32.totalorder %s1104_s12, %s888_s11 }
  0x40   : > { %p885_p5 = pnand %p883_p4, %p869_p12  ;;  %p891_p13 = scmp.lt.s32.totalorder %s889_s13, %s882_s7 }
  0x42   : > { %p886_p0 = pneg %p885_p5  ;;  %p892_p7 = por %p891_p13, %p890_p6 }
  0x44   : > { %p893_p3 = pnand %p892_p7, %p886_p0 }
  0x46   : > { %896 = shalt.err (!%p893_p3)
}
  0x47   : > { %s971_s14 = smov 512   ;;  %s972_s22 = smov 256  }
  0x48   : > { %s973_s5 = smov 16   ;;  %p1249_p12 = scmp.ne.s32.totalorder %s1244_s29, 0 }
  0x49   : > { %751 = dma.hbm_to_vmem [thread:$0]  (!%p1248_p11), %s1102_s20, 3584, %s1104_s12, %s1106_s6, %s971_s14, %s972_s22, %s973_s5  }
  0x4a   : > { %199 = sbr.rel (%p1249_p12) target bundleno = 481 (0x1e1), region = 28  ;;  %s1137_s9 = sand.u32 (!%p1249_p12), 1, %s959_s16  }
  0x4b   : > { %s735_s23 = smul.u32 (!%p1249_p12), 224, %s1137_s9  ;;  %s202_s25 = scalar_lea.sflag (!%p1249_p12), [#allocation3], %s1137_s9 }
  0x4c   : > { %p1250_p1 = scmp.ne.s32.totalorder (!%p1249_p12), %s1241_s26, 0 }
  0x4d   : > { %s1141_s30 = scalar_lea.vmem (!%p1249_p12), [#allocation2], %s735_s23 }
  0x51   : > { %942 = dma.done.wait (%p1250_p1), %s202_s25, 3584  }
  0x52   : > { %944 = vsyncadd (%p1250_p1), %s202_s25, 4294963712  ;;  %p1251_p11 = scmp.eq.s32.totalorder %s1022_s19, 0 }
  0x54   : > { %946 = dma.done.wait (%p1251_p11), [#allocation6], 64   ;;  %p1252_p8 = pmov %p1251_p11 }
  0x55   : > { %v974_v0 = vmov 0   ;;  %v797_v1 = vld [vmem:[%s1141_s30 + $0x4] ss:$16 sps:$4 sm:$0xff]   ;;  %v799_v2 = vld [vmem:[%s1141_s30 + $0xc] ss:$16 sps:$4 sm:$0xff]   ;;  %vm422_vm0 = vcmask 916480  }
  0x56   : > { %948 = vsyncadd (%p1252_p8), [#allocation6], 4294967232  ;;  %458 = vmatprep.mubr.bf16.mxu0 %v974_v0  ;;  %499 = vmatprep.mubr.bf16.mxu1 %v974_v0  ;;  %v801_v3 = vld [vmem:[%s1141_s30] ss:$16 sps:$4 sm:$0xff]   ;;  %v802_v4 = vld [vmem:[%s1141_s30 + $0x8] ss:$16 sps:$4 sm:$0xff]  }
  0x57   : > { %426 = vmatprep.subr.bf16.mxu0 %v797_v1  ;;  %467 = vmatprep.subr.bf16.mxu1 %v799_v2  ;;  %v803_v5 = vld [vmem:[%s1141_s30 + $0x24] ss:$16 sps:$4 sm:$0xff]   ;;  %v805_v6 = vld [vmem:[%s1141_s30 + $0x2c] ss:$16 sps:$4 sm:$0xff]   ;;  %v807_v7 = vld [vmem:[%s1141_s30 + $0x20] ss:$16 sps:$4 sm:$0xff]  }
  0x58   : > { %427 = vmatpush1.bf16.msra.mxu0 %v801_v3  ;;  %468 = vmatpush1.bf16.msra.mxu1 %v802_v4  ;;  %v808_v8 = vld [vmem:[%s1141_s30 + $0x28] ss:$16 sps:$4 sm:$0xff]   ;;  %v809_v9 = vld [vmem:[%s1141_s30 + $0x44] ss:$16 sps:$4 sm:$0xff]   ;;  %v811_v10 = vld [vmem:[%s1141_s30 + $0x4c] ss:$16 sps:$4 sm:$0xff]  }
  0x59   : > { %428 = vmatprep.subr.bf16.mxu0 %v803_v5  ;;  %469 = vmatprep.subr.bf16.mxu1 %v805_v6  ;;  %v813_v11 = vld [vmem:[%s1141_s30 + $0x40] ss:$16 sps:$4 sm:$0xff]   ;;  %v814_v12 = vld [vmem:[%s1141_s30 + $0x48] ss:$16 sps:$4 sm:$0xff]   ;;  %v815_v13 = vld [vmem:[%s1141_s30 + $0x64] ss:$16 sps:$4 sm:$0xff]  }
  0x5a   : > { %v817_v14 = vld [vmem:[%s1141_s30 + $0x6c] ss:$16 sps:$4 sm:$0xff]   ;;  %v819_v15 = vld [vmem:[%s1141_s30 + $0x60] ss:$16 sps:$4 sm:$0xff]   ;;  %v820_v16 = vld [vmem:[%s1141_s30 + $0x68] ss:$16 sps:$4 sm:$0xff]  }
  0x5b   : > { %v821_v17 = vld [vmem:[%s1141_s30 + $0x84] ss:$16 sps:$4 sm:$0xff]   ;;  %v823_v18 = vld [vmem:[%s1141_s30 + $0x8c] ss:$16 sps:$4 sm:$0xff]   ;;  %v825_v19 = vld [vmem:[%s1141_s30 + $0x80] ss:$16 sps:$4 sm:$0xff]  }
  0x5c   : > { %429 = vmatpush1.bf16.msra.mxu0 %v807_v7  ;;  %470 = vmatpush1.bf16.msra.mxu1 %v808_v8  ;;  %v826_v20 = vld [vmem:[%s1141_s30 + $0x88] ss:$16 sps:$4 sm:$0xff]   ;;  %v827_v21 = vld [vmem:[%s1141_s30 + $0xa4] ss:$16 sps:$4 sm:$0xff]   ;;  %v829_v22 = vld [vmem:[%s1141_s30 + $0xac] ss:$16 sps:$4 sm:$0xff]  }
  0x5d   : > { %430 = vmatprep.subr.bf16.mxu0 %v809_v9  ;;  %471 = vmatprep.subr.bf16.mxu1 %v811_v10  ;;  %v831_v23 = vld [vmem:[%s1141_s30 + $0xa0] ss:$16 sps:$4 sm:$0xff]   ;;  %v832_v24 = vld [vmem:[%s1141_s30 + $0xa8] ss:$16 sps:$4 sm:$0xff]   ;;  %v833_v25 = vld [vmem:[%s1141_s30 + $0xc4] ss:$16 sps:$4 sm:$0xff]  }
  0x5e   : > { %v835_v26 = vld [vmem:[%s1141_s30 + $0xcc] ss:$16 sps:$4 sm:$0xff]   ;;  %v837_v27 = vld [vmem:[%s1141_s30 + $0xc0] ss:$16 sps:$4 sm:$0xff]   ;;  %v838_v28 = vld [vmem:[%s1141_s30 + $0xc8] ss:$16 sps:$4 sm:$0xff]  }
  0x5f   : > { %v253_v29 = vld [vmem:[#allocation5] sm:$0xf]  ;;  %s694_s26 = sshll.u32 %s1137_s9, 5  ;;  %s733_s8 = sshll.u32 %s1022_s19, 9 }
  0x60   : > { %431 = vmatpush1.bf16.msra.mxu0 %v813_v11  ;;  %472 = vmatpush1.bf16.msra.mxu1 %v814_v12  ;;  %s229_s29 = scalar_lea.vmem [#allocation7], %s694_s26  ;;  %s1184_s7 = scalar_lea.hbm %s1232_s2, %s733_s8 }
  0x61   : > { %432 = vmatprep.subr.bf16.mxu0 %v815_v13  ;;  %473 = vmatprep.subr.bf16.mxu1 %v817_v14  ;;  %s552_s12 = sshll.u32 %s229_s29, 4  ;;  %s530_s10 = scalar_lea.sflag [#allocation4], %s1137_s9  ;;  %s553_s12 = int_to_ptr.vmem [resolvable:$true] %s552_s12 }
  0x62   : > { %s897_s11 = scalar_lea.vmem %s553_s12, 512  ;;  %p1253_p10 = scmp.ne.s32.totalorder %s1242_s27, 0 }
  0x63   : > { %p898_p9 = scmp.ne.s32.totalorder %s553_s12, %s897_s11  ;;  %s975_s13 = smov [#allocation7]  }
  0x64   : > { %433 = vmatpush1.bf16.msra.mxu0 %v819_v15  ;;  %474 = vmatpush1.bf16.msra.mxu1 %v820_v16  ;;  %s901_s14 = sshll.u32 %s975_s13, 4  ;;  %s902_s14 = int_to_ptr.vmem [resolvable:$false] %s901_s14 }
  0x65   : > { %434 = vmatprep.subr.bf16.mxu0 %v821_v17  ;;  %475 = vmatprep.subr.bf16.mxu1 %v823_v18  ;;  %p899_p2 = pnand %p898_p9, %p1253_p10  ;;  %s903_s22 = scalar_lea.vmem %s902_s14, 1024 }
  0x66   : > { %p904_p5 = scmp.lt.s32.totalorder %s553_s12, %s902_s14  ;;  %p905_p0 = scmp.lt.s32.totalorder %s903_s22, %s897_s11 }
  0x67   : > { %p900_p4 = pneg %p899_p2 }
  0x68   : > { %435 = vmatpush1.bf16.msra.mxu0 %v825_v19  ;;  %476 = vmatpush1.bf16.msra.mxu1 %v826_v20  ;;  %p906_p6 = por %p905_p0, %p904_p5 }
  0x69   : > { %436 = vmatprep.subr.bf16.mxu0 %v827_v21  ;;  %477 = vmatprep.subr.bf16.mxu1 %v829_v22 }
  0x6a   : > { %p907_p13 = pnand %p906_p6, %p900_p4 }
  0x6c   : > { %437 = vmatpush1.bf16.msra.mxu0 %v831_v23  ;;  %478 = vmatpush1.bf16.msra.mxu1 %v832_v24 }
  0x6d   : > { %438 = vmatprep.subr.bf16.mxu0 %v833_v25  ;;  %479 = vmatprep.subr.bf16.mxu1 %v835_v26 }
  0x70   : > { %439 = vmatpush1.bf16.msra.mxu0 %v837_v27  ;;  %480 = vmatpush1.bf16.msra.mxu1 %v838_v28 }
  0x73   : > { %725 = vmatmul.mubr.msk.bf16.vlgmr.msra.gmra.mrb[0].mxu0 %vm422_vm0, %v253_v29  ;;  %726 = vmatmul.mubr.msk.bf16.vlgmr.msra.gmra.mrb[0].mxu1 %vm422_vm0, %v253_v29 }
 0x146   : > { %v460_v30 = vpop.f32.mrb[0].mxu0  ;;  %v501_v31 = vpop.f32.mrb[0].mxu1 }
 0x147   : > { %508 = vst [vmem:[%s229_s29] sm:$0xff] %v460_v30  ;;  %v519_v32 = vmul.f32 %v460_v30, %v460_v30  ;;  %510 = vst [vmem:[%s229_s29 + $0x10] sm:$0xff] %v501_v31  ;;  %v462_v33 = vpop.f32.mrb[1].mxu0  ;;  %v503_v34 = vpop.f32.mrb[1].mxu1  ;;  %v521_v35 = vmul.f32 %v501_v31, %v501_v31 }
 0x148   : > { %509 = vst [vmem:[%s229_s29 + $0x8] sm:$0xff] %v462_v33  ;;  %v512_v36 = vadd.f32 %v462_v33, %v460_v30  ;;  %v520_v37 = vmul.f32 %v462_v33, %v462_v33  ;;  %511 = vst [vmem:[%s229_s29 + $0x18] sm:$0xff] %v503_v34  ;;  %v464_v38 = vpop.f32.mrb[2].mxu0  ;;  %v505_v39 = vpop.f32.mrb[2].mxu1  ;;  %v522_v45 = vmul.f32 %v503_v34, %v503_v34 }
 0x149   : > { %v465_v40 = vpop.f32.mrb[3].mxu0  ;;  %v506_v41 = vpop.f32.mrb[3].mxu1 }
 0x14a   : > { %v513_v42 = vadd.f32 %v512_v36, %v501_v31  ;;  %v523_v43 = vadd.f32 %v520_v37, %v519_v32 }
 0x14c   : > { %v514_v44 = vadd.f32 %v513_v42, %v503_v34  ;;  %v524_v46 = vadd.f32 %v523_v43, %v521_v35 }
 0x14e   : > { %515 = vadd.xlane.f32.xlu0 %v514_v44  ;;  %v525_v47 = vadd.f32 %v524_v46, %v522_v45 }
 0x152   : > { %526 = vadd.xlane.f32.xlu0 %v525_v47 }
 0x153   : > { %910 = shalt.err (!%p907_p13)
}
 0x154   : > { %s911_s5 = scalar_lea.hbm %s1184_s7, 512  ;;  %s915_s25 = scalar_lea.hbm %s1232_s2, 1024 }
 0x155   : > { %p912_p7 = scmp.ne.s32.totalorder %s1184_s7, %s911_s5  ;;  %p916_p1 = scmp.lt.u32.totalorder %s1184_s7, %s1232_s2 }
 0x156   : > { %p917_p11 = scmp.lt.u32.totalorder %s915_s25, %s911_s5  ;;  %p919_p9 = scmp.lt.u32.totalorder %s911_s5, %s1184_s7 }
 0x157   : > { %p913_p3 = pnand %p912_p7, %p1253_p10 }
 0x158   : > { %p918_p8 = por %p917_p11, %p916_p1 }
 0x159   : > { %p914_p12 = pneg %p913_p3 }
 0x15a   : > { %p920_p2 = por %p919_p9, %p918_p8 }
 0x15c   : > { %p921_p4 = pnand %p920_p2, %p914_p12 }
 0x15e   : > { %924 = shalt.err (!%p921_p4)
}
 0x15f   : > { %742 = dma.vmem_to_hbm [thread:$0]  (%p1253_p10), %s553_s12, 512, %s1184_s7, %s530_s10   ;;  %vm517_vm1 = vcmask 7168  }
 0x160   : > { %p244_p5 = scmp.lt.s32.totalorder %s1022_s19, 1 }
 0x162   : > { %s1261_s19 = smov (!%p244_p5, %s1022_s19), 1 }
 0x163   : > { %s695_s29 = sshll.u32 %s1261_s19, 3 }
 0x164   : > { %s247_s6 = scalar_lea.vmem %s1233_s3, %s695_s29  ;;  %s251_s14 = scalar_lea.vmem %s1234_s4, %s695_s29 }
 0x1db   : > { %v516_v48 = vpop.xlane.xlu0 %515 }
 0x1dc   : > { %518 = vst.msk [vmem:[%s247_s6] sm:$0xff] %vm517_vm1, %v516_v48 }
 0x1df   : > { %v527_v49 = vpop.xlane.xlu0 %526 }
 0x1e0   : > { %528 = vst.msk [vmem:[%s251_s14] sm:$0xff] %vm517_vm1, %v527_v49 }
 0x1e1 PF: > { %s570_s27 = sand.u32 1, %s955_s15   ;;  %p1254_p10 = scmp.ne.s32.totalorder %s1243_s28, 0 }
 0x1e2   : > { %p1255_p0 = scmp.ge.s32.totalorder %s967_s18, 2  ;;  %s571_s19 = scalar_lea.sflag [#allocation4], %s570_s27 }
 0x1e4   : > { %p753_p6 = pnand %p1255_p0, %p1254_p10 }
 0x1e6   : > { %950 = dma.done.wait (!%p753_p6), %s571_s19, 512  }
 0x1e7   : > { %952 = vsyncadd (!%p753_p6), %s571_s19, 4294966784  ;;  %p19_p13 = scmp.ge.s32.totalorder %s1026_s21, 4   ;;  %s1256_s15 = smov %s959_s16 }
 0x1e8   : > { %s1257_s16 = smov %s963_s17  ;;  %s1258_s17 = smov %s1038_s24 }
 0x1e9   : > { %s1259_s18 = smov %s1026_s21  ;;  %21 = sbr.rel (!%p19_p13) target bundleno = 6 (0x6), region = 101 }
 0x1f0   :  { %590 = vsyncpa [#allocation3], 1 }
 0x1f1   :  { %592 = vsyncpa [#allocation3 + $0x1], 1 }
 0x1f2   :  { %593 = vsyncpa [#allocation6], 1 }
 0x1f3   :  { %594 = vsyncpa [#allocation4], 1 }
 0x1f4   :  { %596 = vsyncpa [#allocation4 + $0x1], 1 }

</bundles_post_ra>
